<compile_context>
chip_gen: v7x
topology: tpu7x:2x2x1
jax: 0.10.0
libtpu: 0.0.40
codegen_flags: <defaults>
</compile_context>

<pallas_src>
import jax
import jax.numpy as jnp
from jax.experimental import pallas as pl
from jax.experimental.pallas import tpu as pltpu


def _round_up(x, m):
    return (x + m - 1) // m * m


def _feature_column_kernel(x_ref, w1_ref, b1_ref, w2_ref, b2_ref,
                           hid_ref, out1_ref):
    # ---- layer 1: hidden = relu(x @ W1 + b1)   (MXU, N = out_chP lanes) ----
    h = jnp.dot(x_ref[...], w1_ref[...], preferred_element_type=jnp.float32)
    h = jnp.maximum(h + b1_ref[...], 0.0)          # b1 is (1, out_chP): sublane broadcast
    hid_ref[...] = h.astype(hid_ref.dtype)

    # ---- layer 2: out1 = hidden @ w2 + b2, computed transposed as w2 . h^T ----
    # lhs (8, out_chP) x rhs (TB, out_chP), contracting last dims -> (8, TB).
    # Row 0 of the lhs holds the real weights (rows 1..7 are zero padding), so the
    # out1 store is a dense lane-major slab instead of a (TB, 1) fully-masked column.
    o = jax.lax.dot_general(
        w2_ref[...], h, (((1,), (1,)), ((), ())),
        preferred_element_type=jnp.float32)
    out1_ref[...] = (o + b2_ref[0]).astype(out1_ref.dtype)


_TB_MAX = 512  # batch tile; fits comfortably in VMEM with 2x buffering on all chips


def feature_column_forward(x, w1, b1, w2, b2):
    """Fused forward pass of featureColumn.

    Args:
      x:  (B, inChannel) float32
      w1: (inChannel, outChannel)   -- transpose of PyTorch linear1.weight
      b1: (outChannel,)
      w2: (outChannel, 1)           -- transpose of PyTorch linear2.weight
      b2: (1,)
    Returns:
      (out1, hid) with shapes (B, 1) and (B, outChannel), matching PyTorch forward.
    """
    B, in_ch = x.shape
    out_ch = w1.shape[1]
    dt = x.dtype

    # Pad out_ch to a lane-dense multiple of 128; pad batch to the tile size.
    out_chp = _round_up(out_ch, 128)
    if B <= _TB_MAX:
        b_pad = _round_up(B, 8)
        tb = b_pad
    else:
        tb = _TB_MAX
        b_pad = _round_up(B, tb)
    grid = (b_pad // tb,)

    xp = jnp.pad(x, ((0, b_pad - B), (0, 0)))
    w1p = jnp.pad(w1, ((0, 0), (0, out_chp - out_ch))).astype(dt)
    b1p = jnp.pad(b1, (0, out_chp - out_ch)).reshape(1, out_chp).astype(dt)
    # w2 as an 8-row block (row 0 = real weights, rest zeros) so the second dot has a
    # full sublane group and out1 is emitted as a dense (8, TB) block.
    w2p = jnp.pad(w2.reshape(1, out_ch), ((0, 7), (0, out_chp - out_ch))).astype(dt)
    b2s = b2.reshape(1).astype(dt)

    flops = 2 * b_pad * in_ch * out_chp + 2 * b_pad * out_chp * 8
    bytes_accessed = 4 * (b_pad * in_ch + in_ch * out_chp + out_chp
                          + 8 * out_chp + 1 + b_pad * out_chp + 8 * b_pad)

    hid_p, out1_wide = pl.pallas_call(
        _feature_column_kernel,
        out_shape=(
            jax.ShapeDtypeStruct((b_pad, out_chp), dt),   # hidden (padded)
            jax.ShapeDtypeStruct((8, b_pad), dt),         # out1 as lane-dense rows
        ),
        grid=grid,
        in_specs=[
            pl.BlockSpec((tb, in_ch), lambda i: (i, 0)),        # x batch tile
            pl.BlockSpec((in_ch, out_chp), lambda i: (0, 0)),   # W1 (resident)
            pl.BlockSpec((1, out_chp), lambda i: (0, 0)),       # b1 (resident)
            pl.BlockSpec((8, out_chp), lambda i: (0, 0)),       # W2 rows (resident)
            pl.BlockSpec(memory_space=pltpu.MemorySpace.SMEM),  # b2 scalar
        ],
        out_specs=(
            pl.BlockSpec((tb, out_chp), lambda i: (i, 0)),
            pl.BlockSpec((8, tb), lambda i: (0, i)),
        ),
        compiler_params=pltpu.CompilerParams(
            dimension_semantics=("parallel",),
        ),
        cost_estimate=pl.CostEstimate(
            flops=flops, transcendentals=0, bytes_accessed=bytes_accessed),
    )(xp, w1p, b1p, w2p, b2s)

    hid = hid_p[:B, :out_ch]
    out1 = out1_wide[0, :B].reshape(B, 1)
    return out1, hid


def _reference(x, w1, b1, w2, b2):
    hp = jax.lax.Precision.HIGHEST
    h = jnp.maximum(jnp.dot(x, w1, precision=hp) + b1[None, :], 0.0)
    return jnp.dot(h, w2, precision=hp) + b2[None, :], h


if __name__ == "__main__":
    # Small shapes consistent with the module: batch=8, inChannel=32, outChannel=64.
    B, in_ch, out_ch = 8, 32, 64

    key = jax.random.PRNGKey(0)
    kx, kw1, kb1, kw2, kb2 = jax.random.split(key, 5)

    x = jax.random.normal(kx, (B, in_ch), dtype=jnp.float32)
    # Deterministic synthetic init (stands in for the `init` dict the torch module copies from).
    w1 = jax.random.normal(kw1, (in_ch, out_ch), dtype=jnp.float32) * 0.05
    b1 = jax.random.normal(kb1, (out_ch,), dtype=jnp.float32) * 0.05
    w2 = jax.random.normal(kw2, (out_ch, 1), dtype=jnp.float32) * 0.05
    b2 = jax.random.normal(kb2, (1,), dtype=jnp.float32) * 0.05

    fwd = jax.jit(feature_column_forward)

    # Single-tile path (B <= TB).
    out1, hid = fwd(x, w1, b1, w2, b2)
    jax.block_until_ready((out1, hid))
    ref1, ref_h = _reference(x, w1, b1, w2, b2)
    assert out1.shape == (B, 1) and hid.shape == (B, out_ch)
    assert jnp.allclose(out1, ref1, atol=1e-5, rtol=1e-5)
    assert jnp.allclose(hid, ref_h, atol=1e-5, rtol=1e-5)

    # Multi-tile / padded-batch path (exercises the grid + double-buffered pipeline).
    B2 = 1037
    x2 = jax.random.normal(jax.random.PRNGKey(1), (B2, in_ch), dtype=jnp.float32)
    out1_2, hid_2 = fwd(x2, w1, b1, w2, b2)
    jax.block_until_ready((out1_2, hid_2))
    ref1_2, ref_h2 = _reference(x2, w1, b1, w2, b2)
    assert out1_2.shape == (B2, 1) and hid_2.shape == (B2, out_ch)
    assert jnp.allclose(out1_2, ref1_2, atol=1e-5, rtol=1e-5)
    assert jnp.allclose(hid_2, ref_h2, atol=1e-5, rtol=1e-5)

    print("KERNEL_OK")
</pallas_src>

<mosaic_0001>
module attributes {stable_mosaic.version = 11 : i64} {
  func.func @_feature_column_kernel(%arg0: i32, %arg1: memref<8x32xf32, #tpu.memory_space<vmem>>, %arg2: memref<32x128xf32, #tpu.memory_space<vmem>>, %arg3: memref<1x128xf32, #tpu.memory_space<vmem>>, %arg4: memref<8x128xf32, #tpu.memory_space<vmem>>, %arg5: memref<1xf32, #tpu.memory_space<smem>>, %arg6: memref<8x128xf32, #tpu.memory_space<vmem>>, %arg7: memref<8x8xf32, #tpu.memory_space<vmem>>) attributes {dimension_semantics = [#tpu.dimension_semantics<parallel>], iteration_bounds = array<i64: 1>, scalar_prefetch = 0 : i64, scratch_operands = 0 : i64, tpu.core_type = #tpu.core_type<tc>, window_params = [{transform_indices = @transform_0, window_bounds = array<i64: 8, 32>}, {pipeline_mode = #tpu.pipeline_mode<synchronous>, transform_indices = @transform_1, window_bounds = array<i64: 32, 128>}, {pipeline_mode = #tpu.pipeline_mode<synchronous>, transform_indices = @transform_2, window_bounds = array<i64: 1, 128>}, {pipeline_mode = #tpu.pipeline_mode<synchronous>, transform_indices = @transform_3, window_bounds = array<i64: 8, 128>}, {transform_indices = @transform_4, window_bounds = array<i64: 1>}, {transform_indices = @transform_5, window_bounds = array<i64: 8, 128>}, {transform_indices = @transform_6, window_bounds = array<i64: 8, 8>}]} {
    %c0 = arith.constant 0 : index
    %c0_0 = arith.constant 0 : index
    %0 = vector.load %arg1[%c0, %c0_0] : memref<8x32xf32, #tpu.memory_space<vmem>>, vector<8x32xf32>
    %c0_1 = arith.constant 0 : index
    %c0_2 = arith.constant 0 : index
    %1 = vector.load %arg2[%c0_1, %c0_2] : memref<32x128xf32, #tpu.memory_space<vmem>>, vector<32x128xf32>
    %cst = arith.constant dense<0.000000e+00> : vector<8x128xf32>
    %2 = tpu.matmul %0, %1, %cst {dimension_numbers = #tpu.dot_dimension_numbers<[1], [0], [0], [1], [0, 0, 1, 1], [], []>} : vector<8x32xf32>, vector<32x128xf32>, vector<8x128xf32> -> vector<8x128xf32>
    %c0_3 = arith.constant 0 : index
    %c0_4 = arith.constant 0 : index
    %3 = vector.load %arg3[%c0_3, %c0_4] : memref<1x128xf32, #tpu.memory_space<vmem>>, vector<1x128xf32>
    %4 = vector.broadcast %3 : vector<1x128xf32> to vector<8x128xf32>
    %5 = arith.addf %2, %4 : vector<8x128xf32>
    %cst_5 = arith.constant 0.000000e+00 : f32
    %6 = vector.broadcast %cst_5 : f32 to vector<8x128xf32>
    %7 = arith.maximumf %5, %6 : vector<8x128xf32>
    %c0_6 = arith.constant 0 : index
    %c0_7 = arith.constant 0 : index
    %8 = vector.load %arg6[%c0_6, %c0_7] : memref<8x128xf32, #tpu.memory_space<vmem>>, vector<8x128xf32>
    tpu.vector_store %arg6[%c0_6, %c0_7], %7 {strides = array<i32>} : memref<8x128xf32, #tpu.memory_space<vmem>>, vector<8x128xf32>,
    %c0_8 = arith.constant 0 : index
    %c0_9 = arith.constant 0 : index
    %9 = vector.load %arg4[%c0_8, %c0_9] : memref<8x128xf32, #tpu.memory_space<vmem>>, vector<8x128xf32>
    %cst_10 = arith.constant dense<0.000000e+00> : vector<8x8xf32>
    %10 = tpu.matmul %9, %7, %cst_10 {dimension_numbers = #tpu.dot_dimension_numbers<[1], [1], [0], [0], [0, 0, 1, 0], [], []>} : vector<8x128xf32>, vector<8x128xf32>, vector<8x8xf32> -> vector<8x8xf32>
    %c0_11 = arith.constant 0 : index
    %11 = memref.load %arg5[%c0_11] : memref<1xf32, #tpu.memory_space<smem>>
    %12 = vector.broadcast %11 : f32 to vector<8x8xf32>
    %13 = arith.addf %10, %12 : vector<8x8xf32>
    %c0_12 = arith.constant 0 : index
    %c0_13 = arith.constant 0 : index
    %14 = vector.load %arg7[%c0_12, %c0_13] : memref<8x8xf32, #tpu.memory_space<vmem>>, vector<8x8xf32>
    tpu.vector_store %arg7[%c0_12, %c0_13], %13 {strides = array<i32>} : memref<8x8xf32, #tpu.memory_space<vmem>>, vector<8x8xf32>,
    return
  }
  func.func @transform_0(%arg0: i32) -> (i32, i32) {
    %c0_i32 = arith.constant 0 : i32
    %c0_i32_0 = arith.constant 0 : i32
    return %arg0, %c0_i32 : i32, i32
  }
  func.func @transform_1(%arg0: i32) -> (i32, i32) {
    %c0_i32 = arith.constant 0 : i32
    %c0_i32_0 = arith.constant 0 : i32
    %c0_i32_1 = arith.constant 0 : i32
    return %c0_i32, %c0_i32_0 : i32, i32
  }
  func.func @transform_2(%arg0: i32) -> (i32, i32) {
    %c0_i32 = arith.constant 0 : i32
    %c0_i32_0 = arith.constant 0 : i32
    %c0_i32_1 = arith.constant 0 : i32
    return %c0_i32, %c0_i32_0 : i32, i32
  }
  func.func @transform_3(%arg0: i32) -> (i32, i32) {
    %c0_i32 = arith.constant 0 : i32
    %c0_i32_0 = arith.constant 0 : i32
    %c0_i32_1 = arith.constant 0 : i32
    return %c0_i32, %c0_i32_0 : i32, i32
  }
  func.func @transform_4(%arg0: i32) -> i32 {
    %c0_i32 = arith.constant 0 : i32
    %c0_i32_0 = arith.constant 0 : i32
    return %c0_i32 : i32
  }
  func.func @transform_5(%arg0: i32) -> (i32, i32) {
    %c0_i32 = arith.constant 0 : i32
    %c0_i32_0 = arith.constant 0 : i32
    return %arg0, %c0_i32 : i32, i32
  }
  func.func @transform_6(%arg0: i32) -> (i32, i32) {
    %c0_i32 = arith.constant 0 : i32
    %c0_i32_0 = arith.constant 0 : i32
    return %c0_i32, %arg0 : i32, i32
  }
}

</mosaic_0001>

<bundles_post_ra>
// kernel: feature_column_forward.1
= control target key start
LH: loop header
LB: loop body
LE: loop exit
PB: predicated region body
PF: predicated region fallthrough
CT: control target
= control target key end

     0   :  { %v264_v3 = vmov 0.0|0.0   ;;  %vm265_vm0 = vmmov 0   ;;  %v266_v6 = vmov 0.0   ;;  %s342_s0 = inlined_call_operand.vmem [shape: f32[8,32], index: 0, kind: input, shape index: {}]   ;;  %s343_s1 = inlined_call_operand.vmem [shape: f32[32,128], index: 1, kind: input, shape index: {}]   ;;  %s344_s2 = inlined_call_operand.vmem [shape: f32[1,128], index: 2, kind: input, shape index: {}]   ;;  %s345_s3 = inlined_call_operand.vmem [shape: f32[8,128], index: 3, kind: input, shape index: {}]   ;;  %s346_s4 = inlined_call_operand.<no memory space> [shape: f32[1], index: 4, kind: input, shape index: {}]   ;;  %s347_s5 = inlined_call_operand.hbm [shape: f32[8,128], index: 5, kind: output, shape index: {0}]   ;;  %s348_s6 = inlined_call_operand.vmem [shape: f32[8,8], index: 6, kind: output, shape index: {1}]  }
   0x1   :  { %v25_v0 = vld [vmem:[%s343_s1] sm:$0xff]  ;;  %v26_v1 = vld [vmem:[%s343_s1 + $0x8] sm:$0xff]  ;;  %v27_v2 = vld [vmem:[%s343_s1 + $0x10] sm:$0xff]  ;;  %230 = vmatprep.subr.bf16.mxu0 %v264_v3  ;;  %222 = vmatprep.mubr.msk.f32.mxu0 %vm265_vm0, %v266_v6 }
   0x2   :  { %v231_v4 = vpack.c.bf16 %v26_v1, %v25_v0  ;;  %v28_v5 = vld [vmem:[%s343_s1 + $0x18] sm:$0xff]  ;;  %225 = vmatprep.subr.mxu1 %v266_v6  ;;  %227 = vmatprep.mubr.msk.f32.mxu1 %vm265_vm0, %v266_v6 }
   0x3   :  { %13 = vsyncpa [#allocation4], 0  ;;  %v234_v7 = vpack.c.bf16 %v28_v5, %v27_v2  ;;  %v24_v8 = vld [vmem:[%s342_s0] sm:$0xff]  ;;  %vm36_vm1 = vcmask 261120   ;;  %s267_s10 = smov [#allocation3]  }
   0x4   :  { %232 = vmatpush3.bf16.msra.mxu0 %v231_v4  ;;  %v205_v9 = vld [vmem:[%s344_s2] ss:$0 sm:$0xff]  ;;  %s193_s11 = sshll.u32 %s267_s10, 4  ;;  %s194_s11 = int_to_ptr.vmem [resolvable:$true] %s193_s11 }
   0x5   :  { %233 = vmatprep.subr.bf16.mxu0 %v264_v3  ;;  %v112_v14 = vld [vmem:[%s345_s3] sm:$0xff]  ;;  %s240_s0 = scalar_lea.vmem %s194_s11, 128  ;;  %p245_p1 = scmp.lt.s32.totalorder %s194_s11, %s194_s11 }
   0x6   :  { %p241_p0 = scmp.ne.s32.totalorder %s194_s11, %s240_s0  ;;  %p246_p2 = scmp.lt.s32.totalorder %s240_s0, %s240_s0 }
   0x8   :  { %235 = vmatpush3.bf16.msra.mxu0 %v234_v7  ;;  %p247_p3 = por %p246_p2, %p245_p1 }
   0xa   :  { %p248_p4 = pnand %p247_p3, %p241_p0 }
   0xb   :  { %223 = vmatmul.mubr.msk.f32.vlgmr.msra.gmra.mrb[0].mxu0 %vm36_vm1, %v24_v8 }
  0xde   :  { %v106_v10 = vpop.f32.mrb[0].mxu0 }
  0xdf   :  { %v107_v11 = vadd.f32 %v205_v9, %v106_v10  ;;  %v224_v12 = vpop.f32.mrb[1].mxu0 }
  0xe1   :  { %v110_v13 = vmax.f32 %v107_v11, 0.0 }
  0xe3   :  { %111 = vst [vmem:[#allocation3] sm:$0xff] %v110_v13  ;;  %226 = vmatpush3.xpose.msra.mxu1 %v110_v13 }
  0xe6   :  { %228 = vmatmul.mubr.f32.vlgmr.msra.gmra.mrb[0].mxu1 %v112_v14 }
  0xe7   :  { %251 = shalt.err (!%p248_p4)
}
  0xe8   :  { %s252_s13 = scalar_lea.hbm %s347_s5, 128 }
  0xe9   :  { %p253_p5 = scmp.ne.s32.totalorder %s347_s5, %s252_s13  ;;  %p256_p6 = scmp.lt.u32.totalorder %s252_s13, %s347_s5 }
  0xeb   :  { %p258_p7 = pnand %p256_p6, %p253_p5 }
  0xed   :  { %261 = shalt.err (!%p258_p7)
}
  0xee   :  { %196 = dma.vmem_to_hbm [thread:$0]  %s194_s11, 128, %s347_s5, [#allocation4]   ;;  %v114_v15 = vstv %s346_s4  ;;  %vm185_vm2 = vcmask 64512  }
 0x1b9   :  { %v181_v16 = vpop.f32.mrb[0].mxu1 }
 0x1ba   :  { %v182_v17 = vadd.f32 %v181_v16, %v114_v15  ;;  %v229_v18 = vpop.f32.mrb[1].mxu1 }
 0x1bc   :  { %186 = vst.msk [vmem:[%s348_s6] sm:$0xff] %vm185_vm2, %v182_v17 }
 0x1bd   :  { %262 = dma.done.wait [#allocation4], 128  }
 0x1be   :  { %263 = vsyncadd [#allocation4], 4294967168 }
 0x1bf   :  { %204 = vsyncpa [#allocation4], 1 }

</bundles_post_ra>
